<compile_context>
chip_gen: v7x
topology: tpu7x:2x2x1
jax: 0.10.0
libtpu: 0.0.40
codegen_flags: <defaults>
</compile_context>

<pallas_src>
import functools
import math

import jax
import jax.numpy as jnp
from jax import lax
from jax.experimental import pallas as pl
from jax.experimental.pallas import tpu as pltpu


# ----------------------------------------------------------------------------
# Helpers
# ----------------------------------------------------------------------------
def _layer_norm(v, g, b, eps=1e-5):
    mu = jnp.mean(v, axis=-1, keepdims=True)
    var = jnp.mean((v - mu) ** 2, axis=-1, keepdims=True)
    return (v - mu) * lax.rsqrt(var + eps) * g + b


def _vmem_limit_bytes(per_buffer_bytes, scratch_bytes=0, headroom=1 << 20):
    # double-buffered pipeline blocks + scratch + headroom, clamped to
    # [4 MiB, 64 MiB] (64 MiB = v7x physical VMEM per TensorCore).
    total = 2 * per_buffer_bytes + scratch_bytes + headroom
    return int(min(max(total, 4 << 20), 64 << 20))


# ----------------------------------------------------------------------------
# Kernel 1: all transformer blocks, grid=(B, L), activations carried in VMEM
# ----------------------------------------------------------------------------
def _layers_kernel(
    x0_ref,                                  # (T, D) f32 embeddings (this batch)
    wqkv_ref, bqkv_ref,                      # (D, 3D) bf16, (1, 3D) f32
    wo_ref, bo_ref,                          # (D, D) bf16, (1, D) f32
    ln1g_ref, ln1b_ref, ln2g_ref, ln2b_ref,  # (1, D) f32
    w1_ref, b1_ref, w2_ref, b2_ref,          # (D,F) bf16, (1,F), (F,D) bf16, (1,D)
    xout_ref,                                # (T, D) f32 final activations
    x_scr,                                   # (T, D) f32 VMEM carry
    *, n_head,
):
    l = pl.program_id(1)
    n_layer = pl.num_programs(1)

    @pl.when(l == 0)
    def _():
        x_scr[...] = x0_ref[...]

    x = x_scr[...]                           # (T, D) f32
    T, D = x.shape
    Dh = D // n_head
    scale = 1.0 / math.sqrt(Dh)

    # ---- pre-LN causal self-attention ----
    h = _layer_norm(x, ln1g_ref[...], ln1b_ref[...])
    h_b = h.astype(jnp.bfloat16)

    # one fused lane-dense QKV projection: (T, D) @ (D, 3D)
    qkv = jnp.dot(h_b, wqkv_ref[...], preferred_element_type=jnp.float32) \
        + bqkv_ref[...]
    q = qkv[:, 0:D] * scale                  # fold 1/sqrt(Dh) into q once
    k = qkv[:, D:2 * D]
    v = qkv[:, 2 * D:3 * D]

    # causal mask built in-kernel (no O(N^2) HBM mask input)
    row = lax.broadcasted_iota(jnp.int32, (T, T), 0)
    col = lax.broadcasted_iota(jnp.int32, (T, T), 1)
    causal = col <= row

    outs = []
    for hh in range(n_head):                 # static, small n_head
        qh = q[:, hh * Dh:(hh + 1) * Dh].astype(jnp.bfloat16)
        kh = k[:, hh * Dh:(hh + 1) * Dh].astype(jnp.bfloat16)
        vh = v[:, hh * Dh:(hh + 1) * Dh].astype(jnp.bfloat16)
        s = lax.dot_general(qh, kh, (((1,), (1,)), ((), ())),
                            preferred_element_type=jnp.float32)       # (T, T)
        s = jnp.where(causal, s, -1e30)
        m = jnp.max(s, axis=-1, keepdims=True)
        p = jnp.exp(s - m)
        p = p / jnp.sum(p, axis=-1, keepdims=True)                    # exact norm
        oh = jnp.dot(p.astype(jnp.bfloat16), vh,
                     preferred_element_type=jnp.float32)              # (T, Dh)
        outs.append(oh)

    # single fused output projection: (T, D) @ (D, D)
    y_cat = jnp.concatenate(outs, axis=-1).astype(jnp.bfloat16)
    y = jnp.dot(y_cat, wo_ref[...], preferred_element_type=jnp.float32) \
        + bo_ref[...]
    x = x + y

    # ---- pre-LN MLP ----
    h2 = _layer_norm(x, ln2g_ref[...], ln2b_ref[...]).astype(jnp.bfloat16)
    m1 = jnp.dot(h2, w1_ref[...], preferred_element_type=jnp.float32) + b1_ref[...]
    # TODO(synk): torch nn.GELU default is erf-exact; tanh approximation used here.
    m1 = jax.nn.gelu(m1, approximate=True)
    m2 = jnp.dot(m1.astype(jnp.bfloat16), w2_ref[...],
                 preferred_element_type=jnp.float32) + b2_ref[...]
    x = x + m2
    x_scr[...] = x

    @pl.when(l == n_layer - 1)
    def _():
        xout_ref[...] = x


# ----------------------------------------------------------------------------
# Kernel 2: final LayerNorm + head projection + per-token cross-entropy
# ----------------------------------------------------------------------------
def _head_loss_kernel(xf_ref, lnfg_ref, lnfb_ref, wh_ref, tgt_ref, nll_ref):
    # TODO(synk): at production vocab sizes this needs vocab tiling with an
    # online log-sum-exp accumulator; at this size the full (T, V) block fits.
    hf = _layer_norm(xf_ref[...], lnfg_ref[...], lnfb_ref[...]).astype(jnp.bfloat16)
    logits = jnp.dot(hf, wh_ref[...], preferred_element_type=jnp.float32)  # (T, V)
    T, V = logits.shape
    mx = jnp.max(logits, axis=-1, keepdims=True)
    z = logits - mx
    lse = jnp.log(jnp.sum(jnp.exp(z), axis=-1, keepdims=True))
    logp = z - lse
    col = lax.broadcasted_iota(jnp.int32, (T, V), 1)
    tgt = tgt_ref[...]                                                     # (T, 1)
    picked = jnp.sum(jnp.where(col == tgt, logp, 0.0), axis=-1, keepdims=True)
    nll_ref[...] = -picked


# ----------------------------------------------------------------------------
# One-time weight packing (outside the jit'd loss: no per-step repacking)
# ----------------------------------------------------------------------------
def pack_params(params):
    blocks = params["blocks"]

    def stack(fn, dtype):
        return jnp.stack([fn(b) for b in blocks]).astype(dtype)

    packed = {
        "tok_emb": params["tok_emb"].astype(jnp.float32),
        "pos_emb": params["pos_emb"].astype(jnp.float32),
        "wqkv": stack(lambda b: jnp.concatenate([b["wq"], b["wk"], b["wv"]], axis=1),
                      jnp.bfloat16),
        "bqkv": stack(lambda b: jnp.concatenate([b["bq"], b["bk"], b["bv"]], axis=1),
                      jnp.float32),
        "wo": stack(lambda b: b["wo"], jnp.bfloat16),
        "bo": stack(lambda b: b["bo"], jnp.float32),
        "ln1g": stack(lambda b: b["ln1_g"], jnp.float32),
        "ln1b": stack(lambda b: b["ln1_b"], jnp.float32),
        "ln2g": stack(lambda b: b["ln2_g"], jnp.float32),
        "ln2b": stack(lambda b: b["ln2_b"], jnp.float32),
        "w1": stack(lambda b: b["w1"], jnp.bfloat16),
        "b1": stack(lambda b: b["b1"], jnp.float32),
        "w2": stack(lambda b: b["w2"], jnp.bfloat16),
        "b2": stack(lambda b: b["b2"], jnp.float32),
        "lnfg": params["ln_f_g"].astype(jnp.float32),
        "lnfb": params["ln_f_b"].astype(jnp.float32),
        "headw": params["head_w"].astype(jnp.bfloat16),
    }
    return packed


# ----------------------------------------------------------------------------
# Wrapper: embedding lookup + two pallas_calls (layers, then head + CE)
# ----------------------------------------------------------------------------
def transformer_loss_packed(packed, code, n_head):
    inp = code[:, :-1]
    tgt = code[:, 1:].astype(jnp.int32)
    B, T = inp.shape
    D = packed["tok_emb"].shape[1]
    L = packed["wqkv"].shape[0]
    Fm = packed["w1"].shape[2]
    V = packed["headw"].shape[1]

    # plain-JAX glue: embedding gather + positional embedding
    x0 = (packed["tok_emb"][inp] + packed["pos_emb"][:T][None, :, :]).astype(jnp.float32)

    # ---- kernel 1: transformer blocks ----
    def batch_blk(shape):        # (B, ...) -> stream block b
        return pl.BlockSpec((None,) + tuple(shape), lambda b, l: (b,) + (0,) * len(shape))

    def layer_blk(shape):        # (L, ...) -> stream block l
        return pl.BlockSpec((None,) + tuple(shape), lambda b, l: (l,) + (0,) * len(shape))

    in_specs_1 = [
        batch_blk((T, D)),                       # x0
        layer_blk((D, 3 * D)), layer_blk((1, 3 * D)),   # Wqkv, bqkv
        layer_blk((D, D)), layer_blk((1, D)),            # Wo, bo
        layer_blk((1, D)), layer_blk((1, D)),            # ln1 gamma/beta
        layer_blk((1, D)), layer_blk((1, D)),            # ln2 gamma/beta
        layer_blk((D, Fm)), layer_blk((1, Fm)),          # W1, b1
        layer_blk((Fm, D)), layer_blk((1, D)),           # W2, b2
    ]
    out_specs_1 = batch_blk((T, D))

    blk1_bytes = (
        T * D * 4                                 # x0 block
        + D * 3 * D * 2 + 3 * D * 4               # wqkv + bqkv
        + D * D * 2 + D * 4                       # wo + bo
        + 4 * D * 4                               # ln1/ln2 gamma/beta
        + D * Fm * 2 + Fm * 4                     # w1 + b1
        + Fm * D * 2 + D * 4                      # w2 + b2
        + T * D * 4                               # xout block
    )
    xf = pl.pallas_call(
        functools.partial(_layers_kernel, n_head=n_head),
        out_shape=jax.ShapeDtypeStruct((B, T, D), jnp.float32),
        grid=(B, L),
        in_specs=in_specs_1,
        out_specs=out_specs_1,
        scratch_shapes=[pltpu.VMEM((T, D), jnp.float32)],
        compiler_params=pltpu.CompilerParams(
            dimension_semantics=("parallel", "arbitrary"),
            vmem_limit_bytes=_vmem_limit_bytes(blk1_bytes, scratch_bytes=T * D * 4),
        ),
    )(x0,
      packed["wqkv"], packed["bqkv"], packed["wo"], packed["bo"],
      packed["ln1g"], packed["ln1b"], packed["ln2g"], packed["ln2b"],
      packed["w1"], packed["b1"], packed["w2"], packed["b2"])

    # ---- kernel 2: final LN + head + per-token cross-entropy ----
    in_specs_2 = [
        pl.BlockSpec((None, T, D), lambda b: (b, 0, 0)),   # final activations
        pl.BlockSpec((1, D), lambda b: (0, 0)),            # ln_f gamma
        pl.BlockSpec((1, D), lambda b: (0, 0)),            # ln_f beta
        pl.BlockSpec((D, V), lambda b: (0, 0)),            # head weight
        pl.BlockSpec((None, T, 1), lambda b: (b, 0, 0)),   # targets
    ]
    out_specs_2 = pl.BlockSpec((None, T, 1), lambda b: (b, 0, 0))

    blk2_bytes = T * D * 4 + 2 * D * 4 + D * V * 2 + T * 4 + T * 4
    nll = pl.pallas_call(
        _head_loss_kernel,
        out_shape=jax.ShapeDtypeStruct((B, T, 1), jnp.float32),
        grid=(B,),
        in_specs=in_specs_2,
        out_specs=out_specs_2,
        compiler_params=pltpu.CompilerParams(
            dimension_semantics=("parallel",),
            vmem_limit_bytes=_vmem_limit_bytes(blk2_bytes),
        ),
    )(xf, packed["lnfg"], packed["lnfb"], packed["headw"], tgt.reshape(B, T, 1))

    return jnp.mean(nll)


# ----------------------------------------------------------------------------
# Pure-JAX reference (f32) for sanity checking
# ----------------------------------------------------------------------------
def _reference_loss(params, code, n_head):
    inp = code[:, :-1]
    tgt = code[:, 1:]
    T = inp.shape[1]
    x = params["tok_emb"][inp] + params["pos_emb"][:T][None, :, :]

    def ln(v, g, b):
        mu = jnp.mean(v, -1, keepdims=True)
        var = jnp.mean((v - mu) ** 2, -1, keepdims=True)
        return (v - mu) * lax.rsqrt(var + 1e-5) * g[0] + b[0]

    for blk in params["blocks"]:
        h = ln(x, blk["ln1_g"], blk["ln1_b"])
        q = h @ blk["wq"] + blk["bq"][0]
        k = h @ blk["wk"] + blk["bk"][0]
        v = h @ blk["wv"] + blk["bv"][0]
        B, T, D = x.shape
        Dh = D // n_head
        qh = q.reshape(B, T, n_head, Dh).transpose(0, 2, 1, 3)
        kh = k.reshape(B, T, n_head, Dh).transpose(0, 2, 1, 3)
        vh = v.reshape(B, T, n_head, Dh).transpose(0, 2, 1, 3)
        att = jnp.einsum("bhqd,bhkd->bhqk", qh, kh) / math.sqrt(Dh)
        mask = jnp.tril(jnp.ones((T, T), bool))
        att = jnp.where(mask, att, -1e30)
        att = jax.nn.softmax(att, -1)
        y = jnp.einsum("bhqk,bhkd->bhqd", att, vh).transpose(0, 2, 1, 3).reshape(B, T, D)
        x = x + (y @ blk["wo"] + blk["bo"][0])
        h2 = ln(x, blk["ln2_g"], blk["ln2_b"])
        m = jax.nn.gelu(h2 @ blk["w1"] + blk["b1"][0], approximate=True)
        x = x + (m @ blk["w2"] + blk["b2"][0])

    h = ln(x, params["ln_f_g"], params["ln_f_b"])
    logits = h @ params["head_w"]
    logp = jax.nn.log_softmax(logits, -1)
    nll = -jnp.take_along_axis(logp, tgt[..., None], axis=-1)[..., 0]
    return jnp.mean(nll)


# ----------------------------------------------------------------------------
# Deterministic parameter init (mirrors GPT module layout)
# ----------------------------------------------------------------------------
def init_params(key, vocab, block_size, n_layer, n_embd):
    ks = jax.random.split(key, 4 + n_layer)
    D, Fm = n_embd, 4 * n_embd
    params = {
        "tok_emb": 0.02 * jax.random.normal(ks[0], (vocab, D), jnp.float32),
        "pos_emb": 0.02 * jax.random.normal(ks[1], (block_size, D), jnp.float32),
        "ln_f_g": jnp.ones((1, D), jnp.float32),
        "ln_f_b": jnp.zeros((1, D), jnp.float32),
        "head_w": 0.02 * jax.random.normal(ks[2], (D, vocab), jnp.float32),
        "blocks": [],
    }
    for li in range(n_layer):
        bk = jax.random.split(ks[4 + li], 6)
        params["blocks"].append({
            "ln1_g": jnp.ones((1, D), jnp.float32), "ln1_b": jnp.zeros((1, D), jnp.float32),
            "wq": 0.02 * jax.random.normal(bk[0], (D, D), jnp.float32), "bq": jnp.zeros((1, D), jnp.float32),
            "wk": 0.02 * jax.random.normal(bk[1], (D, D), jnp.float32), "bk": jnp.zeros((1, D), jnp.float32),
            "wv": 0.02 * jax.random.normal(bk[2], (D, D), jnp.float32), "bv": jnp.zeros((1, D), jnp.float32),
            "wo": 0.02 * jax.random.normal(bk[3], (D, D), jnp.float32), "bo": jnp.zeros((1, D), jnp.float32),
            "ln2_g": jnp.ones((1, D), jnp.float32), "ln2_b": jnp.zeros((1, D), jnp.float32),
            "w1": 0.02 * jax.random.normal(bk[4], (D, Fm), jnp.float32), "b1": jnp.zeros((1, Fm), jnp.float32),
            "w2": 0.02 * jax.random.normal(bk[5], (Fm, D), jnp.float32), "b2": jnp.zeros((1, D), jnp.float32),
        })
    return params


if __name__ == "__main__":
    # Small config consistent with the module: z_len=9 (T=8 after teacher-forcing
    # shift), z_num (vocab)=64, n_layer=2, n_head=2, n_embd=32, batch=2.
    B, Z_LEN, N_LAYER, N_HEAD, N_EMBD, VOCAB = 2, 9, 2, 2, 32, 64

    key = jax.random.PRNGKey(0)
    kp, kc = jax.random.split(key)
    params = init_params(kp, VOCAB, Z_LEN, N_LAYER, N_EMBD)
    code = jax.random.randint(kc, (B, Z_LEN), 0, VOCAB, dtype=jnp.int32)

    # one-time weight packing (outside the jit'd loss)
    packed = jax.tree_util.tree_map(jax.block_until_ready, pack_params(params))

    loss_fn = jax.jit(functools.partial(transformer_loss_packed, n_head=N_HEAD))
    loss = jax.block_until_ready(loss_fn(packed, code))

    ref = jax.block_until_ready(_reference_loss(params, code, N_HEAD))
    assert jnp.allclose(loss, ref, rtol=2e-2, atol=2e-2), (loss, ref)

    print("KERNEL_OK")
</pallas_src>

<mosaic_0001>
module attributes {stable_mosaic.version = 11 : i64} {
  func.func @_layers_kernel(%arg0: i32, %arg1: i32, %arg2: memref<1x8x32xf32, #tpu.memory_space<vmem>>, %arg3: memref<1x32x96xbf16, #tpu.memory_space<vmem>>, %arg4: memref<1x1x96xf32, #tpu.memory_space<vmem>>, %arg5: memref<1x32x32xbf16, #tpu.memory_space<vmem>>, %arg6: memref<1x1x32xf32, #tpu.memory_space<vmem>>, %arg7: memref<1x1x32xf32, #tpu.memory_space<vmem>>, %arg8: memref<1x1x32xf32, #tpu.memory_space<vmem>>, %arg9: memref<1x1x32xf32, #tpu.memory_space<vmem>>, %arg10: memref<1x1x32xf32, #tpu.memory_space<vmem>>, %arg11: memref<1x32x128xbf16, #tpu.memory_space<vmem>>, %arg12: memref<1x1x128xf32, #tpu.memory_space<vmem>>, %arg13: memref<1x128x32xbf16, #tpu.memory_space<vmem>>, %arg14: memref<1x1x32xf32, #tpu.memory_space<vmem>>, %arg15: memref<1x8x32xf32, #tpu.memory_space<vmem>>, %arg16: memref<8x32xf32, #tpu.memory_space<vmem>>) attributes {dimension_semantics = [#tpu.dimension_semantics<parallel>, #tpu.dimension_semantics<arbitrary>], iteration_bounds = array<i64: 2, 2>, scalar_prefetch = 0 : i64, scratch_operands = 1 : i64, tpu.core_type = #tpu.core_type<tc>, window_params = [{transform_indices = @transform_0, window_bounds = array<i64: 1, 8, 32>}, {transform_indices = @transform_1, window_bounds = array<i64: 1, 32, 96>}, {transform_indices = @transform_2, window_bounds = array<i64: 1, 1, 96>}, {transform_indices = @transform_3, window_bounds = array<i64: 1, 32, 32>}, {transform_indices = @transform_4, window_bounds = array<i64: 1, 1, 32>}, {transform_indices = @transform_5, window_bounds = array<i64: 1, 1, 32>}, {transform_indices = @transform_6, window_bounds = array<i64: 1, 1, 32>}, {transform_indices = @transform_7, window_bounds = array<i64: 1, 1, 32>}, {transform_indices = @transform_8, window_bounds = array<i64: 1, 1, 32>}, {transform_indices = @transform_9, window_bounds = array<i64: 1, 32, 128>}, {transform_indices = @transform_10, window_bounds = array<i64: 1, 1, 128>}, {transform_indices = @transform_11, window_bounds = array<i64: 1, 128, 32>}, {transform_indices = @transform_12, window_bounds = array<i64: 1, 1, 32>}, {transform_indices = @transform_13, window_bounds = array<i64: 1, 8, 32>}]} {
    %c0_i32 = arith.constant 0 : i32
    %0 = arith.cmpi eq, %arg1, %c0_i32 : i32
    %1 = arith.extui %0 : i1 to i32
    %c0_i32_0 = arith.constant 0 : i32
    %2 = arith.cmpi ne, %1, %c0_i32_0 : i32
    scf.if %2 {
      %c0_69 = arith.constant 0 : index
      %c0_70 = arith.constant 0 : index
      %c0_71 = arith.constant 0 : index
      %156 = vector.load %arg2[%c0_69, %c0_70, %c0_71] : memref<1x8x32xf32, #tpu.memory_space<vmem>>, vector<1x8x32xf32>
      %157 = vector.shape_cast %156 : vector<1x8x32xf32> to vector<8x32xf32>
      %c0_72 = arith.constant 0 : index
      %c0_73 = arith.constant 0 : index
      %158 = vector.load %arg16[%c0_72, %c0_73] : memref<8x32xf32, #tpu.memory_space<vmem>>, vector<8x32xf32>
      tpu.vector_store %arg16[%c0_72, %c0_73], %157 {strides = array<i32>} : memref<8x32xf32, #tpu.memory_space<vmem>>, vector<8x32xf32>,
    } else {
    }
    %c0 = arith.constant 0 : index
    %c0_1 = arith.constant 0 : index
    %3 = vector.load %arg16[%c0, %c0_1] : memref<8x32xf32, #tpu.memory_space<vmem>>, vector<8x32xf32>
    %c0_2 = arith.constant 0 : index
    %c0_3 = arith.constant 0 : index
    %c0_4 = arith.constant 0 : index
    %4 = vector.load %arg7[%c0_2, %c0_3, %c0_4] : memref<1x1x32xf32, #tpu.memory_space<vmem>>, vector<1x1x32xf32>
    %5 = vector.shape_cast %4 : vector<1x1x32xf32> to vector<1x32xf32>
    %c0_5 = arith.constant 0 : index
    %c0_6 = arith.constant 0 : index
    %c0_7 = arith.constant 0 : index
    %6 = vector.load %arg8[%c0_5, %c0_6, %c0_7] : memref<1x1x32xf32, #tpu.memory_space<vmem>>, vector<1x1x32xf32>
    %7 = vector.shape_cast %6 : vector<1x1x32xf32> to vector<1x32xf32>
    %cst = arith.constant dense<0.000000e+00> : vector<8xf32>
    %8 = vector.multi_reduction <add>, %3, %cst [1] : vector<8x32xf32> to vector<8xf32>
    %9 = vector.shape_cast %8 : vector<8xf32> to vector<8x1xf32>
    %cst_8 = arith.constant 3.200000e+01 : f32
    %10 = vector.broadcast %cst_8 : f32 to vector<8x1xf32>
    %11 = arith.divf %9, %10 : vector<8x1xf32>
    %12 = vector.broadcast %11 : vector<8x1xf32> to vector<8x32xf32>
    %13 = arith.subf %3, %12 : vector<8x32xf32>
    %14 = arith.mulf %13, %13 : vector<8x32xf32>
    %cst_9 = arith.constant dense<0.000000e+00> : vector<8xf32>
    %15 = vector.multi_reduction <add>, %14, %cst_9 [1] : vector<8x32xf32> to vector<8xf32>
    %16 = vector.shape_cast %15 : vector<8xf32> to vector<8x1xf32>
    %cst_10 = arith.constant 3.200000e+01 : f32
    %17 = vector.broadcast %cst_10 : f32 to vector<8x1xf32>
    %18 = arith.divf %16, %17 : vector<8x1xf32>
    %19 = vector.broadcast %11 : vector<8x1xf32> to vector<8x32xf32>
    %20 = arith.subf %3, %19 : vector<8x32xf32>
    %cst_11 = arith.constant 9.99999974E-6 : f32
    %21 = vector.broadcast %cst_11 : f32 to vector<8x1xf32>
    %22 = arith.addf %18, %21 : vector<8x1xf32>
    %23 = math.rsqrt %22 : vector<8x1xf32>
    %24 = vector.broadcast %23 : vector<8x1xf32> to vector<8x32xf32>
    %25 = arith.mulf %20, %24 : vector<8x32xf32>
    %26 = vector.broadcast %5 : vector<1x32xf32> to vector<8x32xf32>
    %27 = arith.mulf %25, %26 : vector<8x32xf32>
    %28 = vector.broadcast %7 : vector<1x32xf32> to vector<8x32xf32>
    %29 = arith.addf %27, %28 : vector<8x32xf32>
    %30 = arith.truncf %29 : vector<8x32xf32> to vector<8x32xbf16>
    %c0_12 = arith.constant 0 : index
    %c0_13 = arith.constant 0 : index
    %c0_14 = arith.constant 0 : index
    %31 = vector.load %arg3[%c0_12, %c0_13, %c0_14] : memref<1x32x96xbf16, #tpu.memory_space<vmem>>, vector<1x32x96xbf16>
    %32 = vector.shape_cast %31 : vector<1x32x96xbf16> to vector<32x96xbf16>
    %cst_15 = arith.constant dense<0.000000e+00> : vector<8x96xf32>
    %33 = tpu.matmul %30, %32, %cst_15 {dimension_numbers = #tpu.dot_dimension_numbers<[1], [0], [0], [1], [0, 0, 1, 1], [], []>} : vector<8x32xbf16>, vector<32x96xbf16>, vector<8x96xf32> -> vector<8x96xf32>
    %c0_16 = arith.constant 0 : index
    %c0_17 = arith.constant 0 : index
    %c0_18 = arith.constant 0 : index
    %34 = vector.load %arg4[%c0_16, %c0_17, %c0_18] : memref<1x1x96xf32, #tpu.memory_space<vmem>>, vector<1x1x96xf32>
    %35 = vector.shape_cast %34 : vector<1x1x96xf32> to vector<1x96xf32>
    %36 = vector.broadcast %35 : vector<1x96xf32> to vector<8x96xf32>
    %37 = arith.addf %33, %36 : vector<8x96xf32>
    %38 = vector.extract_strided_slice %37 {offsets = [0, 0], sizes = [8, 32], strides = [1, 1]} : vector<8x96xf32> to vector<8x32xf32>
    %cst_19 = arith.constant 2.500000e-01 : f32
    %39 = vector.broadcast %cst_19 : f32 to vector<8x32xf32>
    %40 = arith.mulf %38, %39 : vector<8x32xf32>
    %41 = vector.extract_strided_slice %37 {offsets = [0, 32], sizes = [8, 32], strides = [1, 1]} : vector<8x96xf32> to vector<8x32xf32>
    %42 = vector.extract_strided_slice %37 {offsets = [0, 64], sizes = [8, 32], strides = [1, 1]} : vector<8x96xf32> to vector<8x32xf32>
    %43 = tpu.iota {dimensions = array<i32: 0>} : vector<8x8xi32>
    %44 = tpu.iota {dimensions = array<i32: 1>} : vector<8x8xi32>
    %45 = arith.cmpi sle, %44, %43 : vector<8x8xi32>
    %46 = vector.extract_strided_slice %40 {offsets = [0, 0], sizes = [8, 16], strides = [1, 1]} : vector<8x32xf32> to vector<8x16xf32>
    %47 = arith.truncf %46 : vector<8x16xf32> to vector<8x16xbf16>
    %48 = vector.extract_strided_slice %41 {offsets = [0, 0], sizes = [8, 16], strides = [1, 1]} : vector<8x32xf32> to vector<8x16xf32>
    %49 = arith.truncf %48 : vector<8x16xf32> to vector<8x16xbf16>
    %50 = vector.extract_strided_slice %42 {offsets = [0, 0], sizes = [8, 16], strides = [1, 1]} : vector<8x32xf32> to vector<8x16xf32>
    %51 = arith.truncf %50 : vector<8x16xf32> to vector<8x16xbf16>
    %cst_20 = arith.constant dense<0.000000e+00> : vector<8x8xf32>
    %52 = tpu.matmul %47, %49, %cst_20 {dimension_numbers = #tpu.dot_dimension_numbers<[1], [1], [0], [0], [0, 0, 1, 0], [], []>} : vector<8x16xbf16>, vector<8x16xbf16>, vector<8x8xf32> -> vector<8x8xf32>
    %cst_21 = arith.constant -1.000000e+30 : f32
    %53 = vector.broadcast %cst_21 : f32 to vector<8x8xf32>
    %54 = arith.select %45, %52, %53 : vector<8x8xi1>, vector<8x8xf32>
    %cst_22 = arith.constant dense<0xFF800000> : vector<8xf32>
    %55 = vector.multi_reduction <maximumf>, %54, %cst_22 [1] : vector<8x8xf32> to vector<8xf32>
    %56 = vector.shape_cast %55 : vector<8xf32> to vector<8x1xf32>
    %57 = vector.broadcast %56 : vector<8x1xf32> to vector<8x8xf32>
    %58 = arith.subf %54, %57 : vector<8x8xf32>
    %59 = math.exp %58 : vector<8x8xf32>
    %cst_23 = arith.constant dense<0.000000e+00> : vector<8xf32>
    %60 = vector.multi_reduction <add>, %59, %cst_23 [1] : vector<8x8xf32> to vector<8xf32>
    %61 = vector.shape_cast %60 : vector<8xf32> to vector<8x1xf32>
    %62 = vector.broadcast %61 : vector<8x1xf32> to vector<8x8xf32>
    %63 = arith.divf %59, %62 : vector<8x8xf32>
    %64 = arith.truncf %63 : vector<8x8xf32> to vector<8x8xbf16>
    %cst_24 = arith.constant dense<0.000000e+00> : vector<8x16xf32>
    %65 = tpu.matmul %64, %51, %cst_24 {dimension_numbers = #tpu.dot_dimension_numbers<[1], [0], [0], [1], [0, 0, 1, 1], [], []>} : vector<8x8xbf16>, vector<8x16xbf16>, vector<8x16xf32> -> vector<8x16xf32>
    %66 = vector.extract_strided_slice %40 {offsets = [0, 16], sizes = [8, 16], strides = [1, 1]} : vector<8x32xf32> to vector<8x16xf32>
    %67 = arith.truncf %66 : vector<8x16xf32> to vector<8x16xbf16>
    %68 = vector.extract_strided_slice %41 {offsets = [0, 16], sizes = [8, 16], strides = [1, 1]} : vector<8x32xf32> to vector<8x16xf32>
    %69 = arith.truncf %68 : vector<8x16xf32> to vector<8x16xbf16>
    %70 = vector.extract_strided_slice %42 {offsets = [0, 16], sizes = [8, 16], strides = [1, 1]} : vector<8x32xf32> to vector<8x16xf32>
    %71 = arith.truncf %70 : vector<8x16xf32> to vector<8x16xbf16>
    %cst_25 = arith.constant dense<0.000000e+00> : vector<8x8xf32>
    %72 = tpu.matmul %67, %69, %cst_25 {dimension_numbers = #tpu.dot_dimension_numbers<[1], [1], [0], [0], [0, 0, 1, 0], [], []>} : vector<8x16xbf16>, vector<8x16xbf16>, vector<8x8xf32> -> vector<8x8xf32>
    %cst_26 = arith.constant -1.000000e+30 : f32
    %73 = vector.broadcast %cst_26 : f32 to vector<8x8xf32>
    %74 = arith.select %45, %72, %73 : vector<8x8xi1>, vector<8x8xf32>
    %cst_27 = arith.constant dense<0xFF800000> : vector<8xf32>
    %75 = vector.multi_reduction <maximumf>, %74, %cst_27 [1] : vector<8x8xf32> to vector<8xf32>
    %76 = vector.shape_cast %75 : vector<8xf32> to vector<8x1xf32>
    %77 = vector.broadcast %76 : vector<8x1xf32> to vector<8x8xf32>
    %78 = arith.subf %74, %77 : vector<8x8xf32>
    %79 = math.exp %78 : vector<8x8xf32>
    %cst_28 = arith.constant dense<0.000000e+00> : vector<8xf32>
    %80 = vector.multi_reduction <add>, %79, %cst_28 [1] : vector<8x8xf32> to vector<8xf32>
    %81 = vector.shape_cast %80 : vector<8xf32> to vector<8x1xf32>
    %82 = vector.broadcast %81 : vector<8x1xf32> to vector<8x8xf32>
    %83 = arith.divf %79, %82 : vector<8x8xf32>
    %84 = arith.truncf %83 : vector<8x8xf32> to vector<8x8xbf16>
    %cst_29 = arith.constant dense<0.000000e+00> : vector<8x16xf32>
    %85 = tpu.matmul %84, %71, %cst_29 {dimension_numbers = #tpu.dot_dimension_numbers<[1], [0], [0], [1], [0, 0, 1, 1], [], []>} : vector<8x8xbf16>, vector<8x16xbf16>, vector<8x16xf32> -> vector<8x16xf32>
    %86 = tpu.concatenate %65, %85 in 1 : vector<8x16xf32>, vector<8x16xf32> -> vector<8x32xf32>
    %87 = arith.truncf %86 : vector<8x32xf32> to vector<8x32xbf16>
    %c0_30 = arith.constant 0 : index
    %c0_31 = arith.constant 0 : index
    %c0_32 = arith.constant 0 : index
    %88 = vector.load %arg5[%c0_30, %c0_31, %c0_32] : memref<1x32x32xbf16, #tpu.memory_space<vmem>>, vector<1x32x32xbf16>
    %89 = vector.shape_cast %88 : vector<1x32x32xbf16> to vector<32x32xbf16>
    %cst_33 = arith.constant dense<0.000000e+00> : vector<8x32xf32>
    %90 = tpu.matmul %87, %89, %cst_33 {dimension_numbers = #tpu.dot_dimension_numbers<[1], [0], [0], [1], [0, 0, 1, 1], [], []>} : vector<8x32xbf16>, vector<32x32xbf16>, vector<8x32xf32> -> vector<8x32xf32>
    %c0_34 = arith.constant 0 : index
    %c0_35 = arith.constant 0 : index
    %c0_36 = arith.constant 0 : index
    %91 = vector.load %arg6[%c0_34, %c0_35, %c0_36] : memref<1x1x32xf32, #tpu.memory_space<vmem>>, vector<1x1x32xf32>
    %92 = vector.shape_cast %91 : vector<1x1x32xf32> to vector<1x32xf32>
    %93 = vector.broadcast %92 : vector<1x32xf32> to vector<8x32xf32>
    %94 = arith.addf %90, %93 : vector<8x32xf32>
    %95 = arith.addf %3, %94 : vector<8x32xf32>
    %c0_37 = arith.constant 0 : index
    %c0_38 = arith.constant 0 : index
    %c0_39 = arith.constant 0 : index
    %96 = vector.load %arg9[%c0_37, %c0_38, %c0_39] : memref<1x1x32xf32, #tpu.memory_space<vmem>>, vector<1x1x32xf32>
    %97 = vector.shape_cast %96 : vector<1x1x32xf32> to vector<1x32xf32>
    %c0_40 = arith.constant 0 : index
    %c0_41 = arith.constant 0 : index
    %c0_42 = arith.constant 0 : index
    %98 = vector.load %arg10[%c0_40, %c0_41, %c0_42] : memref<1x1x32xf32, #tpu.memory_space<vmem>>, vector<1x1x32xf32>
    %99 = vector.shape_cast %98 : vector<1x1x32xf32> to vector<1x32xf32>
    %cst_43 = arith.constant dense<0.000000e+00> : vector<8xf32>
    %100 = vector.multi_reduction <add>, %95, %cst_43 [1] : vector<8x32xf32> to vector<8xf32>
    %101 = vector.shape_cast %100 : vector<8xf32> to vector<8x1xf32>
    %cst_44 = arith.constant 3.200000e+01 : f32
    %102 = vector.broadcast %cst_44 : f32 to vector<8x1xf32>
    %103 = arith.divf %101, %102 : vector<8x1xf32>
    %104 = vector.broadcast %103 : vector<8x1xf32> to vector<8x32xf32>
    %105 = arith.subf %95, %104 : vector<8x32xf32>
    %106 = arith.mulf %105, %105 : vector<8x32xf32>
    %cst_45 = arith.constant dense<0.000000e+00> : vector<8xf32>
    %107 = vector.multi_reduction <add>, %106, %cst_45 [1] : vector<8x32xf32> to vector<8xf32>
    %108 = vector.shape_cast %107 : vector<8xf32> to vector<8x1xf32>
    %cst_46 = arith.constant 3.200000e+01 : f32
    %109 = vector.broadcast %cst_46 : f32 to vector<8x1xf32>
    %110 = arith.divf %108, %109 : vector<8x1xf32>
    %111 = vector.broadcast %103 : vector<8x1xf32> to vector<8x32xf32>
    %112 = arith.subf %95, %111 : vector<8x32xf32>
    %cst_47 = arith.constant 9.99999974E-6 : f32
    %113 = vector.broadcast %cst_47 : f32 to vector<8x1xf32>
    %114 = arith.addf %110, %113 : vector<8x1xf32>
    %115 = math.rsqrt %114 : vector<8x1xf32>
    %116 = vector.broadcast %115 : vector<8x1xf32> to vector<8x32xf32>
    %117 = arith.mulf %112, %116 : vector<8x32xf32>
    %118 = vector.broadcast %97 : vector<1x32xf32> to vector<8x32xf32>
    %119 = arith.mulf %117, %118 : vector<8x32xf32>
    %120 = vector.broadcast %99 : vector<1x32xf32> to vector<8x32xf32>
    %121 = arith.addf %119, %120 : vector<8x32xf32>
    %122 = arith.truncf %121 : vector<8x32xf32> to vector<8x32xbf16>
    %c0_48 = arith.constant 0 : index
    %c0_49 = arith.constant 0 : index
    %c0_50 = arith.constant 0 : index
    %123 = vector.load %arg11[%c0_48, %c0_49, %c0_50] : memref<1x32x128xbf16, #tpu.memory_space<vmem>>, vector<1x32x128xbf16>
    %124 = vector.shape_cast %123 : vector<1x32x128xbf16> to vector<32x128xbf16>
    %cst_51 = arith.constant dense<0.000000e+00> : vector<8x128xf32>
    %125 = tpu.matmul %122, %124, %cst_51 {dimension_numbers = #tpu.dot_dimension_numbers<[1], [0], [0], [1], [0, 0, 1, 1], [], []>} : vector<8x32xbf16>, vector<32x128xbf16>, vector<8x128xf32> -> vector<8x128xf32>
    %c0_52 = arith.constant 0 : index
    %c0_53 = arith.constant 0 : index
    %c0_54 = arith.constant 0 : index
    %126 = vector.load %arg12[%c0_52, %c0_53, %c0_54] : memref<1x1x128xf32, #tpu.memory_space<vmem>>, vector<1x1x128xf32>
    %127 = vector.shape_cast %126 : vector<1x1x128xf32> to vector<1x128xf32>
    %128 = vector.broadcast %127 : vector<1x128xf32> to vector<8x128xf32>
    %129 = arith.addf %125, %128 : vector<8x128xf32>
    %130 = arith.mulf %129, %129 : vector<8x128xf32>
    %131 = arith.mulf %129, %130 : vector<8x128xf32>
    %cst_55 = arith.constant 4.471500e-02 : f32
    %132 = vector.broadcast %cst_55 : f32 to vector<8x128xf32>
    %133 = arith.mulf %132, %131 : vector<8x128xf32>
    %134 = arith.addf %129, %133 : vector<8x128xf32>
    %cst_56 = arith.constant 0.797884583 : f32
    %135 = vector.broadcast %cst_56 : f32 to vector<8x128xf32>
    %136 = arith.mulf %135, %134 : vector<8x128xf32>
    %137 = math.tanh %136 : vector<8x128xf32>
    %cst_57 = arith.constant 1.000000e+00 : f32
    %138 = vector.broadcast %cst_57 : f32 to vector<8x128xf32>
    %139 = arith.addf %138, %137 : vector<8x128xf32>
    %cst_58 = arith.constant 5.000000e-01 : f32
    %140 = vector.broadcast %cst_58 : f32 to vector<8x128xf32>
    %141 = arith.mulf %140, %139 : vector<8x128xf32>
    %142 = arith.mulf %129, %141 : vector<8x128xf32>
    %143 = arith.truncf %142 : vector<8x128xf32> to vector<8x128xbf16>
    %c0_59 = arith.constant 0 : index
    %c0_60 = arith.constant 0 : index
    %c0_61 = arith.constant 0 : index
    %144 = vector.load %arg13[%c0_59, %c0_60, %c0_61] : memref<1x128x32xbf16, #tpu.memory_space<vmem>>, vector<1x128x32xbf16>
    %145 = vector.shape_cast %144 : vector<1x128x32xbf16> to vector<128x32xbf16>
    %cst_62 = arith.constant dense<0.000000e+00> : vector<8x32xf32>
    %146 = tpu.matmul %143, %145, %cst_62 {dimension_numbers = #tpu.dot_dimension_numbers<[1], [0], [0], [1], [0, 0, 1, 1], [], []>} : vector<8x128xbf16>, vector<128x32xbf16>, vector<8x32xf32> -> vector<8x32xf32>
    %c0_63 = arith.constant 0 : index
    %c0_64 = arith.constant 0 : index
    %c0_65 = arith.constant 0 : index
    %147 = vector.load %arg14[%c0_63, %c0_64, %c0_65] : memref<1x1x32xf32, #tpu.memory_space<vmem>>, vector<1x1x32xf32>
    %148 = vector.shape_cast %147 : vector<1x1x32xf32> to vector<1x32xf32>
    %149 = vector.broadcast %148 : vector<1x32xf32> to vector<8x32xf32>
    %150 = arith.addf %146, %149 : vector<8x32xf32>
    %151 = arith.addf %95, %150 : vector<8x32xf32>
    %c0_66 = arith.constant 0 : index
    %c0_67 = arith.constant 0 : index
    %152 = vector.load %arg16[%c0_66, %c0_67] : memref<8x32xf32, #tpu.memory_space<vmem>>, vector<8x32xf32>
    tpu.vector_store %arg16[%c0_66, %c0_67], %151 {strides = array<i32>} : memref<8x32xf32, #tpu.memory_space<vmem>>, vector<8x32xf32>,
    %c1_i32 = arith.constant 1 : i32
    %153 = arith.cmpi eq, %arg1, %c1_i32 : i32
    %154 = arith.extui %153 : i1 to i32
    %c0_i32_68 = arith.constant 0 : i32
    %155 = arith.cmpi ne, %154, %c0_i32_68 : i32
    scf.if %155 {
      %c0_69 = arith.constant 0 : index
      %c0_70 = arith.constant 0 : index
      %c0_71 = arith.constant 0 : index
      %156 = vector.load %arg15[%c0_69, %c0_70, %c0_71] : memref<1x8x32xf32, #tpu.memory_space<vmem>>, vector<1x8x32xf32>
      %157 = vector.shape_cast %156 : vector<1x8x32xf32> to vector<8x32xf32>
      %158 = vector.shape_cast %151 : vector<8x32xf32> to vector<1x8x32xf32>
      tpu.vector_store %arg15[%c0_69, %c0_70, %c0_71], %158 {strides = array<i32>} : memref<1x8x32xf32, #tpu.memory_space<vmem>>, vector<1x8x32xf32>,
    } else {
    }
    return
  }
  func.func @transform_0(%arg0: i32, %arg1: i32) -> (i32, i32, i32) {
    %c0_i32 = arith.constant 0 : i32
    %c0_i32_0 = arith.constant 0 : i32
    %c0_i32_1 = arith.constant 0 : i32
    return %arg0, %c0_i32, %c0_i32_0 : i32, i32, i32
  }
  func.func @transform_1(%arg0: i32, %arg1: i32) -> (i32, i32, i32) {
    %c0_i32 = arith.constant 0 : i32
    %c0_i32_0 = arith.constant 0 : i32
    %c0_i32_1 = arith.constant 0 : i32
    return %arg1, %c0_i32, %c0_i32_0 : i32, i32, i32
  }
  func.func @transform_2(%arg0: i32, %arg1: i32) -> (i32, i32, i32) {
    %c0_i32 = arith.constant 0 : i32
    %c0_i32_0 = arith.constant 0 : i32
    %c0_i32_1 = arith.constant 0 : i32
    return %arg1, %c0_i32, %c0_i32_0 : i32, i32, i32
  }
  func.func @transform_3(%arg0: i32, %arg1: i32) -> (i32, i32, i32) {
    %c0_i32 = arith.constant 0 : i32
    %c0_i32_0 = arith.constant 0 : i32
    %c0_i32_1 = arith.constant 0 : i32
    return %arg1, %c0_i32, %c0_i32_0 : i32, i32, i32
  }
  func.func @transform_4(%arg0: i32, %arg1: i32) -> (i32, i32, i32) {
    %c0_i32 = arith.constant 0 : i32
    %c0_i32_0 = arith.constant 0 : i32
    %c0_i32_1 = arith.constant 0 : i32
    return %arg1, %c0_i32, %c0_i32_0 : i32, i32, i32
  }
  func.func @transform_5(%arg0: i32, %arg1: i32) -> (i32, i32, i32) {
    %c0_i32 = arith.constant 0 : i32
    %c0_i32_0 = arith.constant 0 : i32
    %c0_i32_1 = arith.constant 0 : i32
    return %arg1, %c0_i32, %c0_i32_0 : i32, i32, i32
  }
  func.func @transform_6(%arg0: i32, %arg1: i32) -> (i32, i32, i32) {
    %c0_i32 = arith.constant 0 : i32
    %c0_i32_0 = arith.constant 0 : i32
    %c0_i32_1 = arith.constant 0 : i32
    return %arg1, %c0_i32, %c0_i32_0 : i32, i32, i32
  }
  func.func @transform_7(%arg0: i32, %arg1: i32) -> (i32, i32, i32) {
    %c0_i32 = arith.constant 0 : i32
    %c0_i32_0 = arith.constant 0 : i32
    %c0_i32_1 = arith.constant 0 : i32
    return %arg1, %c0_i32, %c0_i32_0 : i32, i32, i32
  }
  func.func @transform_8(%arg0: i32, %arg1: i32) -> (i32, i32, i32) {
    %c0_i32 = arith.constant 0 : i32
    %c0_i32_0 = arith.constant 0 : i32
    %c0_i32_1 = arith.constant 0 : i32
    return %arg1, %c0_i32, %c0_i32_0 : i32, i32, i32
  }
  func.func @transform_9(%arg0: i32, %arg1: i32) -> (i32, i32, i32) {
    %c0_i32 = arith.constant 0 : i32
    %c0_i32_0 = arith.constant 0 : i32
    %c0_i32_1 = arith.constant 0 : i32
    return %arg1, %c0_i32, %c0_i32_0 : i32, i32, i32
  }
  func.func @transform_10(%arg0: i32, %arg1: i32) -> (i32, i32, i32) {
    %c0_i32 = arith.constant 0 : i32
    %c0_i32_0 = arith.constant 0 : i32
    %c0_i32_1 = arith.constant 0 : i32
    return %arg1, %c0_i32, %c0_i32_0 : i32, i32, i32
  }
  func.func @transform_11(%arg0: i32, %arg1: i32) -> (i32, i32, i32) {
    %c0_i32 = arith.constant 0 : i32
    %c0_i32_0 = arith.constant 0 : i32
    %c0_i32_1 = arith.constant 0 : i32
    return %arg1, %c0_i32, %c0_i32_0 : i32, i32, i32
  }
  func.func @transform_12(%arg0: i32, %arg1: i32) -> (i32, i32, i32) {
    %c0_i32 = arith.constant 0 : i32
    %c0_i32_0 = arith.constant 0 : i32
    %c0_i32_1 = arith.constant 0 : i32
    return %arg1, %c0_i32, %c0_i32_0 : i32, i32, i32
  }
  func.func @transform_13(%arg0: i32, %arg1: i32) -> (i32, i32, i32) {
    %c0_i32 = arith.constant 0 : i32
    %c0_i32_0 = arith.constant 0 : i32
    %c0_i32_1 = arith.constant 0 : i32
    return %arg0, %c0_i32, %c0_i32_0 : i32, i32, i32
  }
}

module attributes {stable_mosaic.version = 11 : i64} {
  func.func @_head_loss_kernel(%arg0: i32, %arg1: memref<1x8x32xf32, #tpu.memory_space<vmem>>, %arg2: memref<1x32xf32, #tpu.memory_space<vmem>>, %arg3: memref<1x32xf32, #tpu.memory_space<vmem>>, %arg4: memref<32x64xbf16, #tpu.memory_space<vmem>>, %arg5: memref<1x8x1xi32, #tpu.memory_space<vmem>>, %arg6: memref<1x8x1xf32, #tpu.memory_space<vmem>>) attributes {dimension_semantics = [#tpu.dimension_semantics<parallel>], iteration_bounds = array<i64: 2>, scalar_prefetch = 0 : i64, scratch_operands = 0 : i64, tpu.core_type = #tpu.core_type<tc>, window_params = [{transform_indices = @transform_0, window_bounds = array<i64: 1, 8, 32>}, {pipeline_mode = #tpu.pipeline_mode<synchronous>, transform_indices = @transform_1, window_bounds = array<i64: 1, 32>}, {pipeline_mode = #tpu.pipeline_mode<synchronous>, transform_indices = @transform_2, window_bounds = array<i64: 1, 32>}, {pipeline_mode = #tpu.pipeline_mode<synchronous>, transform_indices = @transform_3, window_bounds = array<i64: 32, 64>}, {transform_indices = @transform_4, window_bounds = array<i64: 1, 8, 1>}, {transform_indices = @transform_5, window_bounds = array<i64: 1, 8, 1>}]} {
    %c0 = arith.constant 0 : index
    %c0_0 = arith.constant 0 : index
    %c0_1 = arith.constant 0 : index
    %0 = vector.load %arg1[%c0, %c0_0, %c0_1] : memref<1x8x32xf32, #tpu.memory_space<vmem>>, vector<1x8x32xf32>
    %1 = vector.shape_cast %0 : vector<1x8x32xf32> to vector<8x32xf32>
    %c0_2 = arith.constant 0 : index
    %c0_3 = arith.constant 0 : index
    %2 = vector.load %arg2[%c0_2, %c0_3] : memref<1x32xf32, #tpu.memory_space<vmem>>, vector<1x32xf32>
    %c0_4 = arith.constant 0 : index
    %c0_5 = arith.constant 0 : index
    %3 = vector.load %arg3[%c0_4, %c0_5] : memref<1x32xf32, #tpu.memory_space<vmem>>, vector<1x32xf32>
    %cst = arith.constant dense<0.000000e+00> : vector<8xf32>
    %4 = vector.multi_reduction <add>, %1, %cst [1] : vector<8x32xf32> to vector<8xf32>
    %5 = vector.shape_cast %4 : vector<8xf32> to vector<8x1xf32>
    %cst_6 = arith.constant 3.200000e+01 : f32
    %6 = vector.broadcast %cst_6 : f32 to vector<8x1xf32>
    %7 = arith.divf %5, %6 : vector<8x1xf32>
    %8 = vector.broadcast %7 : vector<8x1xf32> to vector<8x32xf32>
    %9 = arith.subf %1, %8 : vector<8x32xf32>
    %10 = arith.mulf %9, %9 : vector<8x32xf32>
    %cst_7 = arith.constant dense<0.000000e+00> : vector<8xf32>
    %11 = vector.multi_reduction <add>, %10, %cst_7 [1] : vector<8x32xf32> to vector<8xf32>
    %12 = vector.shape_cast %11 : vector<8xf32> to vector<8x1xf32>
    %cst_8 = arith.constant 3.200000e+01 : f32
    %13 = vector.broadcast %cst_8 : f32 to vector<8x1xf32>
    %14 = arith.divf %12, %13 : vector<8x1xf32>
    %15 = vector.broadcast %7 : vector<8x1xf32> to vector<8x32xf32>
    %16 = arith.subf %1, %15 : vector<8x32xf32>
    %cst_9 = arith.constant 9.99999974E-6 : f32
    %17 = vector.broadcast %cst_9 : f32 to vector<8x1xf32>
    %18 = arith.addf %14, %17 : vector<8x1xf32>
    %19 = math.rsqrt %18 : vector<8x1xf32>
    %20 = vector.broadcast %19 : vector<8x1xf32> to vector<8x32xf32>
    %21 = arith.mulf %16, %20 : vector<8x32xf32>
    %22 = vector.broadcast %2 : vector<1x32xf32> to vector<8x32xf32>
    %23 = arith.mulf %21, %22 : vector<8x32xf32>
    %24 = vector.broadcast %3 : vector<1x32xf32> to vector<8x32xf32>
    %25 = arith.addf %23, %24 : vector<8x32xf32>
    %26 = arith.truncf %25 : vector<8x32xf32> to vector<8x32xbf16>
    %c0_10 = arith.constant 0 : index
    %c0_11 = arith.constant 0 : index
    %27 = vector.load %arg4[%c0_10, %c0_11] : memref<32x64xbf16, #tpu.memory_space<vmem>>, vector<32x64xbf16>
    %cst_12 = arith.constant dense<0.000000e+00> : vector<8x64xf32>
    %28 = tpu.matmul %26, %27, %cst_12 {dimension_numbers = #tpu.dot_dimension_numbers<[1], [0], [0], [1], [0, 0, 1, 1], [], []>} : vector<8x32xbf16>, vector<32x64xbf16>, vector<8x64xf32> -> vector<8x64xf32>
    %cst_13 = arith.constant dense<0xFF800000> : vector<8xf32>
    %29 = vector.multi_reduction <maximumf>, %28, %cst_13 [1] : vector<8x64xf32> to vector<8xf32>
    %30 = vector.shape_cast %29 : vector<8xf32> to vector<8x1xf32>
    %31 = vector.broadcast %30 : vector<8x1xf32> to vector<8x64xf32>
    %32 = arith.subf %28, %31 : vector<8x64xf32>
    %33 = math.exp %32 : vector<8x64xf32>
    %cst_14 = arith.constant dense<0.000000e+00> : vector<8xf32>
    %34 = vector.multi_reduction <add>, %33, %cst_14 [1] : vector<8x64xf32> to vector<8xf32>
    %35 = vector.shape_cast %34 : vector<8xf32> to vector<8x1xf32>
    %36 = math.log %35 : vector<8x1xf32>
    %37 = vector.broadcast %36 : vector<8x1xf32> to vector<8x64xf32>
    %38 = arith.subf %32, %37 : vector<8x64xf32>
    %39 = tpu.iota {dimensions = array<i32: 1>} : vector<8x64xi32>
    %c0_15 = arith.constant 0 : index
    %c0_16 = arith.constant 0 : index
    %c0_17 = arith.constant 0 : index
    %40 = vector.load %arg5[%c0_15, %c0_16, %c0_17] : memref<1x8x1xi32, #tpu.memory_space<vmem>>, vector<1x8x1xi32>
    %41 = vector.shape_cast %40 : vector<1x8x1xi32> to vector<8x1xi32>
    %42 = vector.broadcast %41 : vector<8x1xi32> to vector<8x64xi32>
    %43 = arith.cmpi eq, %39, %42 : vector<8x64xi32>
    %cst_18 = arith.constant 0.000000e+00 : f32
    %44 = vector.broadcast %cst_18 : f32 to vector<8x64xf32>
    %45 = arith.select %43, %38, %44 : vector<8x64xi1>, vector<8x64xf32>
    %cst_19 = arith.constant dense<0.000000e+00> : vector<8xf32>
    %46 = vector.multi_reduction <add>, %45, %cst_19 [1] : vector<8x64xf32> to vector<8xf32>
    %47 = vector.shape_cast %46 : vector<8xf32> to vector<8x1xf32>
    %cst_20 = arith.constant 0.000000e+00 : f32
    %48 = vector.broadcast %cst_20 : f32 to vector<8x1xf32>
    %49 = arith.subf %48, %47 : vector<8x1xf32>
    %c0_21 = arith.constant 0 : index
    %c0_22 = arith.constant 0 : index
    %c0_23 = arith.constant 0 : index
    %50 = vector.load %arg6[%c0_21, %c0_22, %c0_23] : memref<1x8x1xf32, #tpu.memory_space<vmem>>, vector<1x8x1xf32>
    %51 = vector.shape_cast %50 : vector<1x8x1xf32> to vector<8x1xf32>
    %52 = vector.shape_cast %49 : vector<8x1xf32> to vector<1x8x1xf32>
    tpu.vector_store %arg6[%c0_21, %c0_22, %c0_23], %52 {strides = array<i32>} : memref<1x8x1xf32, #tpu.memory_space<vmem>>, vector<1x8x1xf32>,
    return
  }
  func.func @transform_0(%arg0: i32) -> (i32, i32, i32) {
    %c0_i32 = arith.constant 0 : i32
    %c0_i32_0 = arith.constant 0 : i32
    %c0_i32_1 = arith.constant 0 : i32
    return %arg0, %c0_i32, %c0_i32_0 : i32, i32, i32
  }
  func.func @transform_1(%arg0: i32) -> (i32, i32) {
    %c0_i32 = arith.constant 0 : i32
    %c0_i32_0 = arith.constant 0 : i32
    %c0_i32_1 = arith.constant 0 : i32
    return %c0_i32, %c0_i32_0 : i32, i32
  }
  func.func @transform_2(%arg0: i32) -> (i32, i32) {
    %c0_i32 = arith.constant 0 : i32
    %c0_i32_0 = arith.constant 0 : i32
    %c0_i32_1 = arith.constant 0 : i32
    return %c0_i32, %c0_i32_0 : i32, i32
  }
  func.func @transform_3(%arg0: i32) -> (i32, i32) {
    %c0_i32 = arith.constant 0 : i32
    %c0_i32_0 = arith.constant 0 : i32
    %c0_i32_1 = arith.constant 0 : i32
    return %c0_i32, %c0_i32_0 : i32, i32
  }
  func.func @transform_4(%arg0: i32) -> (i32, i32, i32) {
    %c0_i32 = arith.constant 0 : i32
    %c0_i32_0 = arith.constant 0 : i32
    %c0_i32_1 = arith.constant 0 : i32
    return %arg0, %c0_i32, %c0_i32_0 : i32, i32, i32
  }
  func.func @transform_5(%arg0: i32) -> (i32, i32, i32) {
    %c0_i32 = arith.constant 0 : i32
    %c0_i32_0 = arith.constant 0 : i32
    %c0_i32_1 = arith.constant 0 : i32
    return %arg0, %c0_i32, %c0_i32_0 : i32, i32, i32
  }
}

</mosaic_0001>

<bundles_post_ra>
// kernel: transformer_loss_packed.3
= control target key start
LH: loop header
LB: loop body
LE: loop exit
PB: predicated region body
PF: predicated region fallthrough
CT: control target
= control target key end

     0   :  { %s509_s18 = smov 0   ;;  %s552_s0 = inlined_call_operand.vmem [shape: f32[2,8,32], index: 0, kind: input, shape index: {}]   ;;  %s553_s1 = inlined_call_operand.vmem [shape: f32[1,32], index: 1, kind: input, shape index: {}]   ;;  %s554_s2 = inlined_call_operand.vmem [shape: f32[1,32], index: 2, kind: input, shape index: {}]   ;;  %s555_s3 = inlined_call_operand.vmem [shape: bf16[32,64], index: 3, kind: input, shape index: {}]   ;;  %s556_s4 = inlined_call_operand.vmem [shape: s32[2,8,1], index: 4, kind: input, shape index: {}]   ;;  %s557_s5 = inlined_call_operand.vmem [shape: f32[2,8,1], index: 5, kind: output, shape index: {}]  }
   0x1 LB: > { %s422_s19 = sadd.s32 4294967295, %s474_s18   ;;  %p426_p0 = scmp.ge.s32.totalorder %s474_s18, 1  ;;  %s474_s18 = sphi %s509_s18, %s15_s18  }
   0x2   : > { %p195_p1 = scmp.lt.s32.totalorder %s474_s18, 3 }
   0x4   : > { %p196_p2 = pnand %p426_p0, %p195_p1 }
   0x5   : > { %p225_p3 = scmp.lt.s32.totalorder (!%p196_p2), %s422_s19, 1  ;;  %vm241_vm0 = vcmask (!%p196_p2), 261120   ;;  %v460_v7 = vld [vmem:[%s555_s3] sm:$0xff] (!%p196_p2)   ;;  %v476_v8 = vmov (!%p196_p2), 0.0   ;;  %vm477_vm1 = vmmov (!%p196_p2), 0   ;;  %v461_v9 = vld [vmem:[%s555_s3 + $0x8] sm:$0xff] (!%p196_p2)   ;;  %v343_v33 = vlaneseq (!%p196_p2) }
   0x6   : > { %199 = sbr.rel (%p196_p2) target bundleno = 1007 (0x3ef), region = 40  ;;  %440 = vmatprep.subr.bf16.mxu0 (!%p196_p2), %v476_v8  ;;  %444 = vmatprep.mubr.msk.bf16.mxu0 (!%p196_p2), %vm477_vm1, %v476_v8  ;;  %v430_v14 = vld [vmem:[%s553_s1] ss:$0 sm:$0xff] (!%p196_p2)  ;;  %vm330_vm2 = vcmask (!%p196_p2), 523264   ;;  %v478_v25 = vmov (!%p196_p2), 0   ;;  %vm355_vm4 = vcmask (!%p196_p2), 7168  }
   0x7   : > { %441 = vmatpush3.bf16.msra.mxu0 (!%p196_p2), %v460_v7  ;;  %v431_v16 = vld [vmem:[%s554_s2] ss:$0 sm:$0xff] (!%p196_p2)  ;;  %459 = vset.pattern.permute.xlu0 (!%p196_p2), %v478_v25  ;;  %v344_v34 = vand.u32 (!%p196_p2), 127, %v343_v33 }
   0x8   : > { %442 = vmatprep.subr.bf16.mxu0 (!%p196_p2), %v476_v8 }
   0xb   : > { %443 = vmatpush3.bf16.msra.mxu0 (!%p196_p2), %v461_v9 }
   0xd   : > { %s559_s19 = smov (!%p225_p3, %s422_s19), 1 }
   0xe   : > { %s517_s20 = sshll.u32 %s559_s19, 3 }
   0xf   : > { %s228_s23 = scalar_lea.vmem %s552_s0, %s517_s20  ;;  %s232_s9 = scalar_lea.vmem %s556_s4, %s517_s20 }
  0x10   : > { %v238_v0 = vld [vmem:[%s228_s23] sm:$0xff]  ;;  %s236_s12 = scalar_lea.vmem %s557_s5, %s517_s20 }
  0x11   : > { %v242_v1 = vsel %vm241_vm0, %v238_v0, 0.0  ;;  %v345_v26 = vld [vmem:[%s232_s9] sm:$0xff] }
  0x12   : > { %243 = vadd.xlane.f32.xlu0 %v242_v1 }
  0x9f   : > { %v244_v2 = vpop.xlane.xlu0 %243 }
  0xa0   : > { %v246_v3 = vmul.f32 0.03125, %v244_v2 }
  0xa2   : > { %v247_v4 = vsub.f32 %v238_v0, %v246_v3 }
  0xa4   : > { %v248_v5 = vmul.f32 %v247_v4, %v247_v4 }
  0xa6   : > { %v249_v6 = vsel %vm241_vm0, %v248_v5, 0.0 }
  0xa7   : > { %250 = vadd.xlane.f32.xlu0 %v249_v6 }
  0xbd   : > { %347 = vperm.xlu0 %459, %v345_v26  }
 0x134   : > { %v251_v10 = vpop.xlane.xlu0 %250 }
 0x135   : > { %v252_v11 = vmul.f32 0.03125, %v251_v10 }
 0x137   : > { %v253_v12 = vadd.f32 1e-05, %v252_v11 }
 0x139   : > { %462 = vrsqrt.f32 %v253_v12 }
 0x13c   : > { %v348_v35 = vpop.permute.xlu0 %347 }
 0x13d   : > { %vm349_vm3 = vcmp.eq.s32.totalorder %v344_v34, %v348_v35 }
 0x143   : > { %v463_v13 = vpop.eup %462 }
 0x144   : > { %v255_v15 = vmul.f32 %v463_v13, %v247_v4 }
 0x146   : > { %v262_v17 = vmul.f32 %v430_v14, %v255_v15 }
 0x148   : > { %v269_v18 = vadd.f32 %v431_v16, %v262_v17 }
 0x14a   : > { %v270_v19 = vpack.c.bf16 %v269_v18, %v269_v18 }
 0x14c   : > { %445 = vmatmul.mubr.msk.bf16.vlgmr.msra.gmra.mrb[0].mxu0 %vm241_vm0, %v270_v19 }
 0x21f   : > { %v324_v20 = vpop.f32.mrb[0].mxu0 }
 0x220   : > { %v446_v21 = vpop.f32.mrb[1].mxu0  ;;  %v331_v22 = vsel %vm330_vm2, %v324_v20, -inf }
 0x221   : > { %332 = vmax.xlane.f32.xlu1 %v331_v22  ;;  %v327_v23 = vpop.f32.mrb[2].mxu0 }
 0x222   : > { %v447_v24 = vpop.f32.mrb[3].mxu0 }
 0x2ae   : > { %v333_v27 = vpop.xlane.xlu1 %332 }
 0x2af   : > { %v334_v28 = vsub.f32 %v324_v20, %v333_v27 }
 0x2b1   : > { %v335_v29 = vmul.f32 1.442695, %v334_v28 }
 0x2b3   : > { %464 = vpow2.f32 %v335_v29 }
 0x2bd   : > { %v465_v30 = vpop.eup %464 }
 0x2be   : > { %v337_v31 = vsel %vm330_vm2, %v465_v30, 0.0 }
 0x2bf   : > { %338 = vadd.xlane.f32.xlu1 %v337_v31 }
 0x34c   : > { %v339_v32 = vpop.xlane.xlu1 %338 }
 0x34d   : > { %466 = vlog2.f32 %v339_v32 }
 0x357   : > { %v467_v36 = vpop.eup %466 }
 0x358   : > { %v341_v37 = vmul.f32 0.6931472, %v467_v36 }
 0x35a   : > { %v342_v38 = vsub.f32 %v334_v28, %v341_v37 }
 0x35c   : > { %v350_v39 = vsel %vm349_vm3, %v342_v38, 0.0 }
 0x35d   : > { %v351_v40 = vsel %vm330_vm2, %v350_v39, 0.0 }
 0x35e   : > { %352 = vadd.xlane.f32.xlu1 %v351_v40 }
 0x3eb   : > { %v353_v41 = vpop.xlane.xlu1 %352 }
 0x3ec   : > { %v354_v42 = vsub.f32 0.0, %v353_v41 }
 0x3ee   : > { %356 = vst.msk [vmem:[%s236_s12] sm:$0xff] %vm355_vm4, %v354_v42 }
 0x3ef PF: > { %s15_s18 = sadd.s32 1, %s474_s18  }
 0x3f0   : > { %p12_p4 = scmp.ge.s32.totalorder %s15_s18, 4  }
 0x3f2   :  { %14 = sbr.rel (!%p12_p4) target bundleno = 1 (0x1), region = 73 }

// kernel: transformer_loss_packed.2
= control target key start
LH: loop header
LB: loop body
LE: loop exit
PB: predicated region body
PF: predicated region fallthrough
CT: control target
= control target key end

     0   :  { %s1801_s25 = smov 0   ;;  %s1803_s26 = smov 0   ;;  %s2035_s0 = inlined_call_operand.vmem [shape: f32[2,8,32], index: 0, kind: input, shape index: {}]   ;;  %s2036_s1 = inlined_call_operand.vmem [shape: bf16[2,32,96], index: 1, kind: input, shape index: {}]   ;;  %s2037_s2 = inlined_call_operand.vmem [shape: f32[2,1,96], index: 2, kind: input, shape index: {}]   ;;  %s2038_s3 = inlined_call_operand.vmem [shape: bf16[2,32,32], index: 3, kind: input, shape index: {}]   ;;  %s2039_s4 = inlined_call_operand.vmem [shape: f32[2,1,32], index: 4, kind: input, shape index: {}]   ;;  %s2040_s5 = inlined_call_operand.vmem [shape: f32[2,1,32], index: 5, kind: input, shape index: {}]   ;;  %s2041_s6 = inlined_call_operand.vmem [shape: f32[2,1,32], index: 6, kind: input, shape index: {}]   ;;  %s2042_s7 = inlined_call_operand.vmem [shape: f32[2,1,32], index: 7, kind: input, shape index: {}]   ;;  %s2043_s8 = inlined_call_operand.vmem [shape: f32[2,1,32], index: 8, kind: input, shape index: {}]   ;;  %s2044_s9 = inlined_call_operand.vmem [shape: bf16[2,32,128], index: 9, kind: input, shape index: {}]   ;;  %s2045_s10 = inlined_call_operand.vmem [shape: f32[2,1,128], index: 10, kind: input, shape index: {}]   ;;  %s2046_s11 = inlined_call_operand.vmem [shape: bf16[2,128,32], index: 11, kind: input, shape index: {}]   ;;  %s2047_s12 = inlined_call_operand.vmem [shape: f32[2,1,32], index: 12, kind: input, shape index: {}]   ;;  %s2048_s13 = inlined_call_operand.vmem [shape: f32[2,8,32], index: 13, kind: output, shape index: {}]  }
   0x1   :  { %2055 = sst [smem:[#allocation11_spill]] %s2035_s0  ;;  %s1805_s27 = smov 0  }
   0x2   :  { %2056 = sst [smem:[#allocation12_spill]] %s2036_s1  ;;  %s1807_s28 = smov 0  }
   0x3   :  { %2057 = sst [smem:[#allocation13_spill]] %s2038_s3  ;;  %s1809_s29 = smov 0  }
   0x4   :  { %2058 = sst [smem:[#allocation14_spill]] %s2048_s13 }
   0x5 LB: > { %2059 = sst [smem:[#allocation3_spill]] %s1705_s25  ;;  %s32_s30 = sadd.s32 1, %s1713_s27  ;;  %s1721_s29 = sphi %s1809_s29, %s23_s29   ;;  %s1717_s28 = sphi %s1807_s28, %s2084_s28   ;;  %s1713_s27 = sphi %s1805_s27, %s2083_s27   ;;  %s1709_s26 = sphi %s1803_s26, %s2082_s26   ;;  %s1705_s25 = sphi %s1801_s25, %s2081_s25  }
   0x6   : > { %2060 = sst [smem:[#allocation4_spill]] %s1713_s27  ;;  %s35_s14 = sadd.s32 1, %s1717_s28 }
   0x7   : > { %2061 = sst [smem:[#allocation5_spill]] %s1717_s28  ;;  %p33_p0 = scmp.ge.s32.totalorder %s32_s30, 2 }
   0x8   : > { %2062 = sst [smem:[#allocation6_spill]] %s1721_s29  ;;  %p1465_p1 = scmp.ge.s32.totalorder %s1721_s29, 1 }
   0x9   : > { %p502_p2 = scmp.lt.s32.totalorder %s1721_s29, 5  ;;  %s2086_s30 = smov (%p33_p0, %s32_s30), 0 }
   0xa   : > { %2063 = sst [smem:[#allocation7_spill]] %s2086_s30  ;;  %s2088_s14 = smov (!%p33_p0, %s35_s14), %s1717_s28 }
   0xb   : > { %p503_p3 = pnand %p1465_p1, %p502_p2  ;;  %p37_p4 = scmp.ge.s32.totalorder %s2088_s14, 2 }
   0xd   : > { %s2090_s14 = smov (%p37_p4, %s2088_s14), 0  ;;  %506 = sbr.rel (%p503_p3) target bundleno = 2559 (0x9ff), region = 72 }
   0xe   : > { %2064 = sst [smem:[#allocation8_spill]] %s2090_s14 }
  0x14   : > { %p588_p5 = scmp.lt.s32.totalorder %s1709_s26, 1  ;;  %p592_p6 = scmp.lt.s32.totalorder %s1705_s25, 1 }
  0x15   : > { %s2065_s0 = sld [smem:[#allocation11_spill]]  ;;  %s2066_s1 = sld [smem:[#allocation12_spill]] }
  0x16   : > { %s2092_s26 = smov (!%p588_p5, %s1709_s26), 1  ;;  %s2068_s3 = sld [smem:[#allocation13_spill]] }
  0x17   : > { %s1835_s15 = scalar_select %p592_p6, %s1705_s25, 1 }
  0x18   : > { %s1466_s16 = sshll.u32 %s2092_s26, 3  ;;  %s2070_s28 = sld [smem:[#allocation14_spill]] }
  0x19   : > { %s1509_s20 = sshll.u32 %s1835_s15, 4  ;;  %s610_s13 = scalar_lea.vmem %s2040_s5, %s1835_s15 }
  0x1a   : > { %s1878_s25 = scalar_lea.vmem %s2044_s9, %s1509_s20  ;;  %s627_s18 = scalar_lea.vmem %s2045_s10, %s1835_s15 }
  0x1b   : > { %s591_s19 = scalar_lea.vmem %s2065_s0, %s1466_s16  ;;  %s1844_s23 = scalar_lea.vmem %s2066_s1, %s1509_s20 }
  0x1c   : > { %2067 = sst [smem:[#allocation9_spill]] %s1844_s23  ;;  %s1853_s29 = scalar_lea.vmem %s2068_s3, %s1509_s20 }
  0x1d   : > { %2069 = sst [smem:[#allocation10_spill]] %s1853_s29  ;;  %s1512_s17 = sshll.u32 %s1835_s15, 6 }
  0x1e   : > { %s635_s1 = scalar_lea.vmem %s2047_s12, %s1835_s15  ;;  %s1892_s24 = scalar_lea.vmem %s2046_s11, %s1512_s17 }
  0x1f   : > { %s1897_s3 = scalar_lea.vmem %s2070_s28, %s1466_s16  ;;  %s2071_s29 = sld [smem:[#allocation3_spill]] }
  0x25   : > { %p1476_p7 = scmp.ne.s32.totalorder %s2071_s29, 0 }
  0x26   : > { %v645_v0 = vld [vmem:[%s591_s19] sm:$0xff] (!%p1476_p7)  ;;  %vm646_vm0 = vcmask (!%p1476_p7), 261120  }
  0x27   : > { %644 = sbr.rel (%p1476_p7) target bundleno = 46 (0x2e), region = 76  ;;  %647 = vst.msk [vmem:[#allocation2] sm:$0xff] (!%p1476_p7), %vm646_vm0, %v645_v0 }
  0x2e PF: > { %v1900_v1 = vld [vmem:[#allocation2] sm:$0xff]  ;;  %s2072_s20 = sld [smem:[#allocation9_spill]]  ;;  %vm651_vm1 = vcmask 261120   ;;  %v1723_v9 = vmov 0.0   ;;  %vm1724_vm2 = vmmov 0   ;;  %s2073_s26 = scalar_lea.vmem %s2041_s6, %s1835_s15  ;;  %vm758_vm3 = vcmask 130048  }
  0x2f   : > { %v652_v2 = vsel %vm651_vm1, %v1900_v1, 0.0  ;;  %1539 = vmatprep.subr.bf16.mxu0 %v1723_v9  ;;  %1543 = vmatprep.mubr.msk.bf16.mxu0 %vm1724_vm2, %v1723_v9  ;;  %v1477_v15 = vld [vmem:[%s610_s13] ss:$0 sm:$0xff]  ;;  %s2074_s22 = scalar_lea.vmem %s2037_s2, %s1835_s15  ;;  %s1725_s13 = smov 96   ;;  %v748_v35 = vlaneseq  ;;  %vm806_vm5 = vcmask 64512   ;;  %vm824_vm6 = vcmask 1043456  }
  0x30   : > { %653 = vadd.xlane.f32.xlu0 %v652_v2  ;;  %1559 = vmatprep.subr.bf16.mxu1 %v1723_v9  ;;  %v1478_v17 = vld [vmem:[%s2073_s26] ss:$0 sm:$0xff]  ;;  %s1726_s23 = smov 112   ;;  %s1727_s14 = smov 80  }
  0x31   : > { %1561 = vmatprep.mubr.msk.bf16.mxu1 %vm1724_vm2, %v1723_v9  ;;  %v1479_v21 = vld [vmem:[%s2074_s22] ss:$0 sm:$0xff]  ;;  %v749_v36 = vshrl.u32 %v748_v35, 7  ;;  %v751_v37 = vand.u32 127, %v748_v35  ;;  %s1728_s30 = smov 48   ;;  %s1729_s27 = smov 64  }
  0x32   : > { %s2075_s29 = sld [smem:[#allocation10_spill]]  ;;  %s2076_s17 = scalar_lea.vmem %s2039_s4, %s1835_s15 }
  0x33   : > { %vm752_vm4 = vcmp.le.s32.totalorder %v751_v37, %v749_v36  ;;  %v1659_v36 = vld [vmem:[%s1878_s25] sm:$0xff]   ;;  %s2077_s0 = scalar_lea.vmem %s2042_s7, %s1835_s15 }
  0x34   : > { %v1655_v8 = vld [vmem:[%s2072_s20] sm:$0xff]   ;;  %v1656_v10 = vld [vmem:[%s2072_s20 + $0x8] sm:$0xff]   ;;  %s1730_s20 = smov 16  }
  0x35   : > { %1540 = vmatpush3.bf16.msra.mxu0 %v1655_v8 }
  0x36   : > { %1541 = vmatprep.subr.bf16.mxu0 %v1723_v9 }
  0x39   : > { %1542 = vmatpush3.bf16.msra.mxu0 %v1656_v10  ;;  %v1657_v10 = vld [vmem:[%s2075_s29] sm:$0xff]  }
  0x3a   : > { %1547 = vmatprep.subr.bf16.mxu0 %v1723_v9 }
  0xbd   : > { %v654_v3 = vpop.xlane.xlu0 %653 }
  0xbe   : > { %v656_v4 = vmul.f32 0.03125, %v654_v3 }
  0xc0   : > { %v657_v5 = vsub.f32 %v1900_v1, %v656_v4 }
  0xc2   : > { %v658_v6 = vmul.f32 %v657_v5, %v657_v5 }
  0xc4   : > { %v659_v7 = vsel %vm651_vm1, %v658_v6, 0.0 }
  0xc5   : > { %660 = vadd.xlane.f32.xlu0 %v659_v7 }
 0x152   : > { %v661_v11 = vpop.xlane.xlu0 %660 }
 0x153   : > { %v662_v12 = vmul.f32 0.03125, %v661_v11  ;;  %v1658_v11 = vld [vmem:[%s2075_s29 + $0x8] sm:$0xff]  }
 0x155   : > { %v663_v13 = vadd.f32 1e-05, %v662_v12 }
 0x157   : > { %1669 = vrsqrt.f32 %v663_v13 }
 0x161   : > { %v1670_v14 = vpop.eup %1669 }
 0x162   : > { %v665_v16 = vmul.f32 %v1670_v14, %v657_v5 }
 0x164   : > { %v672_v18 = vmul.f32 %v1477_v15, %v665_v16 }
 0x166   : > { %v679_v19 = vadd.f32 %v1478_v17, %v672_v18 }
 0x168   : > { %v680_v20 = vpack.c.bf16 %v679_v19, %v679_v19 }
 0x16a   : > { %1544 = vmatmul.mubr.msk.bf16.vlgmr.msra.gmra.mrb[0].mxu0 %vm651_vm1, %v680_v20 }
 0x16b   : > { %1549 = vmatprep.mubr.msk.bf16.mxu0 %vm1724_vm2, %v1723_v9 }
 0x23d   : > { %v741_v22 = vpop.f32.mrb[0].mxu0 }
 0x23e   : > { %v742_v23 = vadd.f32 %v1479_v21, %v741_v22  ;;  %v1545_v24 = vpop.f32.mrb[1].mxu0 }
 0x23f   : > { %v744_v25 = vpop.f32.mrb[2].mxu0 }
 0x240   : > { %v747_v26 = vmul.f32 0.25, %v742_v23  ;;  %v754_v27 = vpack.c.bf16 %v742_v23, %v742_v23  ;;  %v1546_v28 = vpop.f32.mrb[3].mxu0  ;;  %v1487_v23 = vld [vmem:[%s2076_s17] ss:$0 sm:$0xff] }
 0x242   : > { %v753_v29 = vpack.c.bf16 %v747_v26, %v747_v26  ;;  %756 = vrot.lane.b32.xlu1 %v754_v27, %s1725_s13 }
 0x244   : > { %869 = vrot.lane.b32.xlu0 %v753_v29, %s1726_s23 }
 0x246   : > { %871 = vrot.lane.b32.xlu1 %v754_v27, %s1727_s14  ;;  %s2079_s14 = sld [smem:[#allocation3_spill]] }
 0x24c   : > { %p1506_p8 = scmp.ne.s32.totalorder %s2079_s14, 1 }
 0x2b4   : > { %v757_v30 = vpop.permute.xlu1 %756 }
 0x2b5   : > { %v763_v31 = vsel %vm758_vm3, %v757_v30, 0 }
 0x2b6   : > { %1548 = vmatpush3.bf16.xpose.msra.mxu0 %v763_v31  ;;  %v870_v34 = vpop.permute.xlu0 %869 }
 0x2b7   : > { %1553 = vmatprep.subr.bf16.mxu0 %v1723_v9 }
 0x2b8   : > { %v872_v32 = vpop.permute.xlu1 %871 }
 0x2b9   : > { %v877_v33 = vsel %vm758_vm3, %v872_v32, 0 }
 0x2ba   : > { %1560 = vmatpush3.bf16.xpose.msra.mxu1 %v877_v33 }
 0x2bb   : > { %1571 = vmatprep.subr.bf16.mxu1 %v1723_v9 }
 0x2bd   : > { %1550 = vmatmul.mubr.msk.bf16.vlgmr.msra.gmra.mrb[4].mxu0 %vm758_vm3, %v753_v29 }
 0x2be   : > { %1555 = vmatprep.mubr.msk.bf16.mxu0 %vm1724_vm2, %v1723_v9 }
 0x2c1   : > { %1562 = vmatmul.mubr.msk.bf16.vlgmr.msra.gmra.mrb[0].mxu1 %vm758_vm3, %v870_v34 }
 0x2c2   : > { %1575 = vmatprep.mubr.msk.bf16.mxu1 %vm1724_vm2, %v1723_v9  ;;  %1572 = vmatpush3.bf16.msra.mxu1 %v1657_v10 }
 0x2c3   : > { %1573 = vmatprep.subr.bf16.mxu1 %v1723_v9 }
 0x2c6   : > { %1574 = vmatpush3.bf16.msra.mxu1 %v1658_v11 }
 0x2c7   : > { %1587 = vmatprep.subr.bf16.mxu1 %v1723_v9 }
 0x390   : > { %v799_v38 = vpop.f32.mrb[4].mxu0 }
 0x391   : > { %v805_v39 = vsel %vm752_vm4, %v799_v38, -1e+30  ;;  %v1551_v40 = vpop.f32.mrb[5].mxu0 }
 0x392   : > { %v802_v41 = vpop.f32.mrb[6].mxu0  ;;  %v807_v42 = vsel %vm806_vm5, %v805_v39, -inf }
 0x393   : > { %808 = vmax.xlane.f32.xlu1 %v807_v42  ;;  %v1552_v43 = vpop.f32.mrb[7].mxu0  ;;  %v1491_v41 = vld [vmem:[%s2077_s0] ss:$0 sm:$0xff] }
 0x394   : > { %v913_v44 = vpop.f32.mrb[0].mxu1 }
 0x395   : > { %v919_v45 = vsel %vm752_vm4, %v913_v44, -1e+30  ;;  %v1563_v46 = vpop.f32.mrb[1].mxu1 }
 0x396   : > { %v916_v47 = vpop.f32.mrb[2].mxu1  ;;  %v920_v48 = vsel %vm806_vm5, %v919_v45, -inf }
 0x397   : > { %921 = vmax.xlane.f32.xlu0 %v920_v48  ;;  %v1564_v49 = vpop.f32.mrb[3].mxu1  ;;  %v1661_v47 = vld [vmem:[%s1892_s24] sm:$0xff]   ;;  %v1662_v48 = vld [vmem:[%s1892_s24 + $0x8] sm:$0xff]  }
 0x398   : > { %v1663_v49 = vld [vmem:[%s1892_s24 + $0x10] sm:$0xff]  }
 0x3ad   : > { %932 = vrot.lane.b32.xlu0 %v754_v27, %s1728_s30 }
 0x420   : > { %v809_v50 = vpop.xlane.xlu1 %808 }
 0x421   : > { %v810_v51 = vsub.f32 %v805_v39, %v809_v50  ;;  %v1664_v50 = vld [vmem:[%s1892_s24 + $0x18] sm:$0xff]  }
 0x423   : > { %v811_v52 = vmul.f32 1.442695, %v810_v51  ;;  %v1665_v51 = vld [vmem:[%s1892_s24 + $0x20] sm:$0xff]  }
 0x424   : > { %v922_v53 = vpop.xlane.xlu0 %921 }
 0x425   : > { %1671 = vpow2.f32 %v811_v52  ;;  %v923_v54 = vsub.f32 %v919_v45, %v922_v53  ;;  %v1666_v52 = vld [vmem:[%s1892_s24 + $0x28] sm:$0xff]   ;;  %v1667_v53 = vld [vmem:[%s1892_s24 + $0x30] sm:$0xff]  }
 0x427   : > { %v924_v55 = vmul.f32 1.442695, %v923_v54  ;;  %v1668_v54 = vld [vmem:[%s1892_s24 + $0x38] sm:$0xff]  }
 0x428   : > { %v933_v3 = vpop.permute.xlu0 %932 }
 0x429   : > { %1673 = vpow2.f32 %v924_v55  ;;  %v938_v6 = vsel %vm824_vm6, %v933_v3, 0  ;;  %v1493_v55 = vld [vmem:[%s627_s18] ss:$0 sm:$0xff] }
 0x42f   : > { %v1672_v56 = vpop.eup %1671 }
 0x430   : > { %v813_v57 = vsel %vm806_vm5, %v1672_v56, 0.0 }
 0x431   : > { %814 = vadd.xlane.f32.xlu1 %v813_v57 }
 0x433   : > { %v1674_v58 = vpop.eup %1673 }
 0x434   : > { %v926_v59 = vsel %vm806_vm5, %v1674_v58, 0.0 }
 0x435   : > { %927 = vadd.xlane.f32.xlu1 %v926_v59 }
 0x446   : > { %819 = vrot.lane.b32.xlu1 %v754_v27, %s1729_s27 }
 0x4be   : > { %v815_v60 = vpop.xlane.xlu1 %814 }
 0x4bf   : > { %1675 = vrcp.f32 %v815_v60 }
 0x4c2   : > { %v928_v61 = vpop.xlane.xlu1 %927 }
 0x4c3   : > { %1677 = vrcp.f32 %v928_v61 }
 0x4c6   : > { %v820_v62 = vpop.permute.xlu1 %819 }
 0x4c7   : > { %v826_v63 = vsel %vm824_vm6, %v820_v62, 0 }
 0x4c8   : > { %1554 = vmatpush3.bf16.msra.mxu0 %v826_v63 }
 0x4c9   : > { %v1676_v0 = vpop.eup %1675  ;;  %1565 = vmatprep.subr.bf16.mxu0 %v1723_v9 }
 0x4ca   : > { %v817_v2 = vmul.f32 %v1676_v0, %v1672_v56 }
 0x4cc   : > { %v818_v4 = vpack.c.bf16 %v817_v2, %v817_v2 }
 0x4cd   : > { %v1678_v5 = vpop.eup %1677 }
 0x4ce   : > { %1556 = vmatmul.mubr.msk.bf16.vlgmr.msra.gmra.mrb[8].mxu0 %vm806_vm5, %v818_v4  ;;  %v930_v7 = vmul.f32 %v1678_v5, %v1674_v58 }
 0x4cf   : > { %1566 = vmatpush3.bf16.msra.mxu0 %v938_v6  ;;  %1567 = vmatprep.mubr.msk.bf16.mxu0 %vm1724_vm2, %v1723_v9 }
 0x4d0   : > { %1579 = vmatprep.subr.bf16.mxu0 %v1723_v9  ;;  %v931_v8 = vpack.c.bf16 %v930_v7, %v930_v7  ;;  %v1497_v7 = vld [vmem:[%s635_s1] ss:$0 sm:$0xff] }
 0x4d6   : > { %1568 = vmatmul.mubr.msk.bf16.vlgmr.msra.gmra.mrb[12].mxu0 %vm806_vm5, %v931_v8 }
 0x4d7   : > { %1583 = vmatprep.mubr.msk.bf16.mxu0 %vm1724_vm2, %v1723_v9  ;;  %1580 = vmatpush3.bf16.msra.mxu0 %v1659_v36 }
 0x4d8   : > { %1581 = vmatprep.subr.bf16.mxu0 %v1723_v9 }
 0x5a1   : > { %v862_v12 = vpop.f32.mrb[8].mxu0 }
 0x5a2   : > { %v1557_v13 = vpop.f32.mrb[9].mxu0 }
 0x5a3   : > { %v865_v14 = vpop.f32.mrb[10].mxu0 }
 0x5a4   : > { %v1558_v15 = vpop.f32.mrb[11].mxu0 }
 0x5a9   : > { %v974_v16 = vpop.f32.mrb[12].mxu0 }
 0x5aa   : > { %981 = vrot.lane.b32.xlu1 %v974_v16, %s1730_s20  ;;  %v1569_v17 = vpop.f32.mrb[13].mxu0 }
 0x5ab   : > { %v977_v18 = vpop.f32.mrb[14].mxu0 }
 0x5ac   : > { %v1570_v19 = vpop.f32.mrb[15].mxu0 }
 0x61c   : > { %v982_v20 = vpop.permute.xlu1 %981 }
 0x61d   : > { %v984_v21 = vsel %vm758_vm3, %v862_v12, %v982_v20 }
 0x61e   : > { %v985_v22 = vpack.c.bf16 %v984_v21, %v984_v21 }
 0x620   : > { %1576 = vmatmul.mubr.msk.bf16.vlgmr.msra.gmra.mrb[4].mxu1 %vm651_vm1, %v985_v22 }
 0x621   : > { %1603 = vmatprep.mubr.msk.bf16.mxu1 %vm1724_vm2, %v1723_v9  ;;  %1588 = vmatpush3.bf16.msra.mxu1 %v1661_v47 }
 0x622   : > { %1589 = vmatprep.subr.bf16.mxu1 %v1723_v9 }
 0x625   : > { %1590 = vmatpush3.bf16.msra.mxu1 %v1662_v48 }
 0x626   : > { %1591 = vmatprep.subr.bf16.mxu1 %v1723_v9 }
 0x629   : > { %1592 = vmatpush3.bf16.msra.mxu1 %v1663_v49 }
 0x62a   : > { %1593 = vmatprep.subr.bf16.mxu1 %v1723_v9 }
 0x62d   : > { %1594 = vmatpush3.bf16.msra.mxu1 %v1664_v50 }
 0x62e   : > { %1595 = vmatprep.subr.bf16.mxu1 %v1723_v9 }
 0x631   : > { %1596 = vmatpush3.bf16.msra.mxu1 %v1665_v51 }
 0x632   : > { %1597 = vmatprep.subr.bf16.mxu1 %v1723_v9 }
 0x635   : > { %1598 = vmatpush3.bf16.msra.mxu1 %v1666_v52 }
 0x636   : > { %1599 = vmatprep.subr.bf16.mxu1 %v1723_v9 }
 0x639   : > { %1600 = vmatpush3.bf16.msra.mxu1 %v1667_v53 }
 0x63a   : > { %1601 = vmatprep.subr.bf16.mxu1 %v1723_v9 }
 0x63d   : > { %1602 = vmatpush3.bf16.msra.mxu1 %v1668_v54 }
 0x6f3   : > { %v1046_v24 = vpop.f32.mrb[4].mxu1 }
 0x6f4   : > { %v1047_v25 = vadd.f32 %v1487_v23, %v1046_v24  ;;  %v1577_v26 = vpop.f32.mrb[5].mxu1 }
 0x6f5   : > { %v1049_v27 = vpop.f32.mrb[6].mxu1 }
 0x6f6   : > { %v1970_v28 = vadd.f32 %v1047_v25, %v1900_v1  ;;  %v1578_v29 = vpop.f32.mrb[7].mxu1  ;;  %v1660_v1 = vld [vmem:[%s1878_s25 + $0x8] sm:$0xff]   ;;  %s2078_s25 = scalar_lea.vmem %s2043_s8, %s1835_s15 }
 0x6f7   : > { %1582 = vmatpush3.bf16.msra.mxu0 %v1660_v1  ;;  %v1492_v43 = vld [vmem:[%s2078_s25] ss:$0 sm:$0xff] }
 0x6f8   : > { %v1055_v30 = vsel %vm651_vm1, %v1970_v28, 0.0 }
 0x6f9   : > { %1056 = vadd.xlane.f32.xlu1 %v1055_v30 }
 0x786   : > { %v1057_v31 = vpop.xlane.xlu1 %1056 }
 0x787   : > { %v1058_v32 = vmul.f32 0.03125, %v1057_v31 }
 0x789   : > { %v1059_v33 = vsub.f32 %v1970_v28, %v1058_v32 }
 0x78b   : > { %v1060_v34 = vmul.f32 %v1059_v33, %v1059_v33 }
 0x78d   : > { %v1061_v35 = vsel %vm651_vm1, %v1060_v34, 0.0 }
 0x78e   : > { %1062 = vadd.xlane.f32.xlu0 %v1061_v35 }
 0x81b   : > { %v1063_v37 = vpop.xlane.xlu0 %1062 }
 0x81c   : > { %v1064_v38 = vmul.f32 0.03125, %v1063_v37 }
 0x81e   : > { %v1065_v39 = vadd.f32 1e-05, %v1064_v38 }
 0x820   : > { %1679 = vrsqrt.f32 %v1065_v39 }
 0x82a   : > { %v1680_v40 = vpop.eup %1679 }
 0x82b   : > { %v1067_v42 = vmul.f32 %v1680_v40, %v1059_v33 }
 0x82d   : > { %v1074_v44 = vmul.f32 %v1491_v41, %v1067_v42 }
 0x82f   : > { %v1081_v45 = vadd.f32 %v1492_v43, %v1074_v44 }
 0x831   : > { %v1082_v46 = vpack.c.bf16 %v1081_v45, %v1081_v45 }
 0x833   : > { %1584 = vmatmul.mubr.msk.bf16.vlgmr.msra.gmra.mrb[16].mxu0 %vm651_vm1, %v1082_v46 }
 0x906   : > { %v1143_v56 = vpop.f32.mrb[16].mxu0 }
 0x907   : > { %v1144_v57 = vadd.f32 %v1493_v55, %v1143_v56  ;;  %v1585_v58 = vpop.f32.mrb[17].mxu0 }
 0x908   : > { %v1146_v59 = vpop.f32.mrb[18].mxu0 }
 0x909   : > { %v1149_v60 = vmul.f32 %v1144_v57, %v1144_v57  ;;  %v1586_v61 = vpop.f32.mrb[19].mxu0 }
 0x90b   : > { %v1150_v62 = vmul.f32 %v1149_v60, %v1144_v57 }
 0x90d   : > { %v1151_v63 = vmul.f32 0.044715, %v1150_v62 }
 0x90f   : > { %v1152_v0 = vadd.f32 %v1151_v63, %v1144_v57 }
 0x911   : > { %v1153_v2 = vmul.f32 0.7978846, %v1152_v0 }
 0x913   : > { %1681 = vtanh.f32 %v1153_v2 }
 0x91d   : > { %v1682_v3 = vpop.eup %1681 }
 0x91e   : > { %v1155_v9 = vadd.f32 1.0, %v1682_v3 }
 0x920   : > { %v1156_v4 = vmul.f32 0.5, %v1155_v9 }
 0x922   : > { %v1157_v5 = vmul.f32 %v1156_v4, %v1144_v57 }
 0x924   : > { %v1158_v6 = vpack.c.bf16 %v1157_v5, %v1157_v5 }
 0x926   : > { %1604 = vmatmul.mubr.bf16.vlgmr.msra.gmra.mrb[8].mxu1 %v1158_v6 }
 0x9f8   : > { %1275 = sbr.rel (%p1506_p8) target bundleno = 2559 (0x9ff), region = 80 }
 0x9f9   : > { %v1264_v8 = vpop.f32.mrb[8].mxu1 }
 0x9fa   : > { %v1265_v10 = vadd.f32 %v1497_v7, %v1264_v8  ;;  %v1605_v11 = vpop.f32.mrb[9].mxu1 }
 0x9fb   : > { %v1267_v12 = vpop.f32.mrb[10].mxu1 }
 0x9fc   : > { %v1270_v13 = vadd.f32 %v1265_v10, %v1970_v28  ;;  %v1606_v14 = vpop.f32.mrb[11].mxu1 }
 0x9fe   : > { %1271 = vst.msk [vmem:[#allocation2] sm:$0xff] %vm651_vm1, %v1270_v13  ;;  %1276 = vst.msk [vmem:[%s1897_s3] sm:$0xff] (!%p1506_p8), %vm651_vm1, %v1270_v13 }
 0x9ff PF: > { %s2080_s30 = sld [smem:[#allocation6_spill]]  ;;  %s2081_s25 = sld [smem:[#allocation4_spill]] }
 0xa00   : > { %s2082_s26 = sld [smem:[#allocation5_spill]]  ;;  %s2083_s27 = sld [smem:[#allocation7_spill]] }
 0xa01   : > { %s2084_s28 = sld [smem:[#allocation8_spill]] }
 0xa05   : > { %s23_s29 = sadd.s32 1, %s2080_s30  }
 0xa06   : > { %p20_p9 = scmp.ge.s32.totalorder %s23_s29, 6  }
 0xa08   :  { %22 = sbr.rel (!%p20_p9) target bundleno = 5 (0x5), region = 146 }

</bundles_post_ra>
